<compile_context>
chip_gen: v7x
topology: tpu7x:2x2x1
jax: 0.10.0
libtpu: 0.0.40
codegen_flags: <defaults>
</compile_context>

<pallas_src>
import functools

import jax
import jax.numpy as jnp
from jax import lax
from jax.experimental import pallas as pl
from jax.experimental.pallas import tpu as pltpu

_EPS = 1e-8  # torch.cosine_similarity eps


def colar_dynamic_kernel(x_ref, wkv1_ref, bkv1_ref, wkv2_ref, bkv2_ref,
                         w3t_ref, b3t_ref, out_ref, *, b_blk, t, cp, approx):
    f32 = jnp.float32
    bt = b_blk * t
    mm_dtype = wkv1_ref.dtype

    # ---- per-sample frame-position masks (cheap iota/VPU, no selector matmuls)
    t_iota = lax.broadcasted_iota(jnp.int32, (b_blk, t, 1), 1)
    not_first = (t_iota != 0).astype(f32).reshape(bt, 1)
    not_last = (t_iota != t - 1).astype(f32).reshape(bt, 1)
    is_last = (lax.broadcasted_iota(jnp.int32, (1, t, 1), 1) == t - 1).astype(f32)

    def attend(kv):
        """kv: (bt, 2*cp) f32 -> softmax-blended V, (bt, cp) f32."""
        k = kv[:, :cp].reshape(b_blk, t, cp)
        v = kv[:, cp:].reshape(b_blk, t, cp)
        k_last = k[:, t - 1:t, :]                                # (b, 1, cp)
        dots = jnp.sum(k * k_last, axis=-1, keepdims=True)       # (b, t, 1)
        kk = jnp.sum(k * k, axis=-1, keepdims=True)              # (b, t, 1)
        ll = jnp.sum(k_last * k_last, axis=-1, keepdims=True)    # (b, 1, 1)
        # torch.cosine_similarity clamps each norm to eps separately:
        # dot/(max(|k|,eps)*max(|kl|,eps)) == dot*rsqrt(max(kk,e2)*max(ll,e2))
        cos = dots * lax.rsqrt(jnp.maximum(kk, _EPS * _EPS) *
                               jnp.maximum(ll, _EPS * _EPS))
        # cos is bounded in [-1, 1] so exp needs no max-shift for stability.
        e = jnp.exp(cos)                                          # (b, t, 1)
        seg_ev = jnp.sum(e * v, axis=1, keepdims=True)            # (b, 1, cp)
        seg_e = jnp.sum(e, axis=1, keepdims=True)                 # (b, 1, 1)
        y_sum = seg_ev * pl.reciprocal(seg_e, approx=approx)      # (b, 1, cp)
        # add the softmax-weighted sum onto each sample's last frame only
        return (v + is_last * y_sum).reshape(bt, cp)

    # ---- layer 1: fused K/V 1x1 conv + cosine attention + ReLU --------------
    kv1 = (jnp.dot(x_ref[...], wkv1_ref[...], preferred_element_type=f32)
           + bkv1_ref[...])
    feat1 = jnp.maximum(attend(kv1), 0.0)                         # (bt, cp) f32

    # ---- layer 2: fused K/V 3-tap conv (roll + mask shifts) + attention -----
    f_prev = (pltpu.roll(feat1, 1, axis=0) * not_first).astype(mm_dtype)
    f_next = (pltpu.roll(feat1, bt - 1, axis=0) * not_last).astype(mm_dtype)
    f_mid = feat1.astype(mm_dtype)
    kv2 = (jnp.dot(f_prev, wkv2_ref[0], preferred_element_type=f32)
           + jnp.dot(f_mid, wkv2_ref[1], preferred_element_type=f32)
           + jnp.dot(f_next, wkv2_ref[2], preferred_element_type=f32)
           + bkv2_ref[...])
    feat2 = jnp.maximum(attend(kv2), 0.0)                         # (bt, cp) f32

    # ---- output projection: one lane-dense (ch_out, bt) matmul + slab store -
    o = lax.dot_general(w3t_ref[...], feat2.astype(mm_dtype),
                        (((1,), (1,)), ((), ())),
                        preferred_element_type=f32) + b3t_ref[...]
    out_ref[0] = o.astype(out_ref.dtype)


def _round_up(v, m):
    return -(-v // m) * m


def _pad_last(a, width):
    pad = width - a.shape[-1]
    if pad:
        a = jnp.pad(a, [(0, 0)] * (a.ndim - 1) + [(0, pad)])
    return a


def _fuse_kv(wk, wv, cp):
    """Zero-pad K/V output channels to cp each and concat along the last axis
    (so both halves are 128-lane aligned). 3-tap weights also get their
    input-channel axis padded to cp."""
    wk, wv = _pad_last(wk, cp), _pad_last(wv, cp)
    if wk.ndim == 3 and wk.shape[1] != cp:
        p = [(0, 0), (0, cp - wk.shape[1]), (0, 0)]
        wk, wv = jnp.pad(wk, p), jnp.pad(wv, p)
    return jnp.concatenate([wk, wv], axis=-1)


def _pick_b_blk(B, T, row_bytes, weight_bytes, target, budget):
    divisors = [d for d in range(1, B + 1) if B % d == 0]
    aligned = [d for d in divisors if (d * T) % 8 == 0 or d == B]
    fits = [d for d in aligned
            if 2 * weight_bytes + 2 * d * T * row_bytes <= budget]
    # prefer: fits the VMEM budget, keeps >= 2 grid steps (both v7x TCs busy),
    # and does not exceed the requested target block size.
    for cands in ([d for d in fits if B // d >= 2 and d <= target],
                  [d for d in fits if d <= target],
                  fits):
        if cands:
            return max(cands)
    return min(aligned) if aligned else B


def colar_dynamic(x, params, *, matmul_dtype=jnp.bfloat16, b_blk_target=8,
                  vmem_budget=48 * 1024 * 1024):
    """x: (B, T, ch_in) channel-last (the tensor the PyTorch module receives
    before its internal permute).  Returns (B, ch_out, T), matching Conv1d."""
    B, T, ch_in = x.shape
    C = params["wk1"].shape[1]
    ch_out = params["w3"].shape[1]
    Cp = _round_up(C, 128)
    mm = matmul_dtype
    approx = mm != jnp.float32

    # ---- fuse + pad weights once (cheap XLA ops; precompute in deployment) --
    wkv1 = _fuse_kv(params["wk1"], params["wv1"], Cp).astype(mm)   # (ch_in, 2Cp)
    bkv1 = _fuse_kv(params["bk1"], params["bv1"], Cp)              # (1, 2Cp) f32
    wkv2 = _fuse_kv(params["wk2"], params["wv2"], Cp).astype(mm)   # (3, Cp, 2Cp)
    bkv2 = _fuse_kv(params["bk2"], params["bv2"], Cp)              # (1, 2Cp) f32
    w3t = _pad_last(jnp.transpose(params["w3"]), Cp).astype(mm)    # (ch_out, Cp)
    b3t = jnp.transpose(params["b3"])                              # (ch_out, 1)

    # ---- VMEM budget-aware batch blocking ------------------------------------
    itm = jnp.dtype(mm).itemsize
    weight_bytes = ((ch_in * 2 * Cp + 3 * Cp * 2 * Cp + ch_out * Cp) * itm
                    + (2 * 2 * Cp + ch_out) * 4)
    row_bytes = (2 * 2 * Cp + 6 * Cp) * 4 + (ch_in + ch_out) * itm
    b_blk = _pick_b_blk(B, T, row_bytes, weight_bytes, b_blk_target, vmem_budget)
    BT = b_blk * T
    nb = B // b_blk

    x2 = x.reshape(B * T, ch_in).astype(mm)

    kernel = functools.partial(colar_dynamic_kernel,
                               b_blk=b_blk, t=T, cp=Cp, approx=approx)

    def wspec(shape):
        return pl.BlockSpec(shape, lambda i, _n=len(shape): (0,) * _n)

    flops = (2 * B * T * (ch_in * 2 * Cp + 3 * Cp * 2 * Cp + Cp * ch_out)
             + 12 * B * T * Cp)
    bytes_accessed = B * T * ch_in * itm + weight_bytes + B * ch_out * T * 4
    vmem_limit = int(min(max(2 * weight_bytes + 2 * BT * row_bytes + (4 << 20),
                             32 << 20), 96 << 20))

    out = pl.pallas_call(
        kernel,
        out_shape=jax.ShapeDtypeStruct((nb, ch_out, BT), x.dtype),
        grid=(nb,),
        in_specs=[
            pl.BlockSpec((BT, ch_in), lambda i: (i, 0)),
            wspec(wkv1.shape), wspec(bkv1.shape),
            wspec(wkv2.shape), wspec(bkv2.shape),
            wspec(w3t.shape), wspec(b3t.shape),
        ],
        out_specs=pl.BlockSpec((1, ch_out, BT), lambda i: (i, 0, 0)),
        compiler_params=pltpu.CompilerParams(
            dimension_semantics=("parallel",),
            vmem_limit_bytes=vmem_limit),
        cost_estimate=pl.CostEstimate(
            flops=int(flops),
            transcendentals=int(6 * B * T),
            bytes_accessed=int(bytes_accessed)),
    )(x2, wkv1, bkv1, wkv2, bkv2, w3t, b3t)

    # restore (B, ch_out, T): cheap layout plumbing outside the kernel.
    out = out.reshape(nb, ch_out, b_blk, T).transpose(0, 2, 1, 3)
    return out.reshape(B, ch_out, T)


# ---------------- pure-JAX reference (for verification only) ----------------
def ref_forward(x, params):
    P = jax.lax.Precision.HIGHEST

    def conv1(a, w, b):
        return jnp.einsum('btc,cd->btd', a, w, precision=P) + b

    def conv3(a, w3, b):
        ap = jnp.pad(a, ((0, 0), (1, 1), (0, 0)))
        return (jnp.einsum('btc,cd->btd', ap[:, :-2], w3[0], precision=P)
                + jnp.einsum('btc,cd->btd', ap[:, 1:-1], w3[1], precision=P)
                + jnp.einsum('btc,cd->btd', ap[:, 2:], w3[2], precision=P) + b)

    def attend(k, v):
        k_last = k[:, -1:, :]
        dots = jnp.sum(k * k_last, axis=-1)
        kn = jnp.linalg.norm(k, axis=-1)
        ln = jnp.linalg.norm(k_last, axis=-1)
        cos = dots / (jnp.maximum(kn, _EPS) * jnp.maximum(ln, _EPS))
        w = jax.nn.softmax(cos, axis=-1)
        y = jnp.einsum('btc,bt->bc', v, w, precision=P)[:, None, :]
        last = v[:, -1:, :] + y
        return jnp.concatenate([v[:, :-1, :], last], axis=1)

    k = conv1(x, params["wk1"], params["bk1"])
    v = conv1(x, params["wv1"], params["bv1"])
    f1 = jax.nn.relu(attend(k, v))
    k2 = conv3(f1, params["wk2"], params["bk2"])
    v2 = conv3(f1, params["wv2"], params["bv2"])
    f2 = jax.nn.relu(attend(k2, v2))
    out = conv1(f2, params["w3"], params["b3"])
    return jnp.transpose(out, (0, 2, 1))


if __name__ == "__main__":
    B, T, ch_in, C, ch_out = 2, 8, 4, 32, 4
    key = jax.random.PRNGKey(0)
    ks = jax.random.split(key, 12)
    s = 0.1
    # Weight layout vs PyTorch: a Conv1d weight (out_ch, in_ch, tap) maps to
    # w[tap] = weight[:, :, tap].T, bias to shape (1, out_ch).
    params = {
        "wk1": jax.random.normal(ks[0], (ch_in, C), jnp.float32) * s,
        "bk1": jax.random.normal(ks[1], (1, C), jnp.float32) * s,
        "wv1": jax.random.normal(ks[2], (ch_in, C), jnp.float32) * s,
        "bv1": jax.random.normal(ks[3], (1, C), jnp.float32) * s,
        "wk2": jax.random.normal(ks[4], (3, C, C), jnp.float32) * s,
        "bk2": jax.random.normal(ks[5], (1, C), jnp.float32) * s,
        "wv2": jax.random.normal(ks[6], (3, C, C), jnp.float32) * s,
        "bv2": jax.random.normal(ks[7], (1, C), jnp.float32) * s,
        "w3": jax.random.normal(ks[8], (C, ch_out), jnp.float32) * s,
        "b3": jax.random.normal(ks[9], (1, ch_out), jnp.float32) * s,
    }
    x = jax.random.normal(ks[10], (B, T, ch_in), jnp.float32)

    ref = ref_forward(x, params)

    # f32 matmul path: strict check against the reference.
    out32 = jax.block_until_ready(
        colar_dynamic(x, params, matmul_dtype=jnp.float32))
    assert out32.shape == (B, ch_out, T), out32.shape
    err32 = float(jnp.max(jnp.abs(out32 - ref)))
    assert jnp.allclose(out32, ref, atol=5e-4, rtol=5e-4), err32

    # bf16 MXU path (default, fast): looser tolerance.
    out16 = jax.block_until_ready(
        colar_dynamic(x, params, matmul_dtype=jnp.bfloat16))
    assert out16.shape == (B, ch_out, T), out16.shape
    err16 = float(jnp.max(jnp.abs(out16 - ref)))
    assert jnp.allclose(out16, ref, atol=3e-2, rtol=3e-2), err16

    print("KERNEL_OK")
</pallas_src>

<mosaic_0001>
module attributes {stable_mosaic.version = 11 : i64} {
  func.func @colar_dynamic_kernel(%arg0: i32, %arg1: memref<8x4xf32, #tpu.memory_space<vmem>>, %arg2: memref<4x256xf32, #tpu.memory_space<vmem>>, %arg3: memref<1x256xf32, #tpu.memory_space<vmem>>, %arg4: memref<3x128x256xf32, #tpu.memory_space<vmem>>, %arg5: memref<1x256xf32, #tpu.memory_space<vmem>>, %arg6: memref<4x128xf32, #tpu.memory_space<vmem>>, %arg7: memref<4x1xf32, #tpu.memory_space<vmem>>, %arg8: memref<1x4x8xf32, #tpu.memory_space<vmem>>) attributes {dimension_semantics = [#tpu.dimension_semantics<parallel>], iteration_bounds = array<i64: 2>, scalar_prefetch = 0 : i64, scratch_operands = 0 : i64, tpu.core_type = #tpu.core_type<tc>, window_params = [{transform_indices = @transform_0, window_bounds = array<i64: 8, 4>}, {pipeline_mode = #tpu.pipeline_mode<synchronous>, transform_indices = @transform_1, window_bounds = array<i64: 4, 256>}, {pipeline_mode = #tpu.pipeline_mode<synchronous>, transform_indices = @transform_2, window_bounds = array<i64: 1, 256>}, {pipeline_mode = #tpu.pipeline_mode<synchronous>, transform_indices = @transform_3, window_bounds = array<i64: 3, 128, 256>}, {pipeline_mode = #tpu.pipeline_mode<synchronous>, transform_indices = @transform_4, window_bounds = array<i64: 1, 256>}, {pipeline_mode = #tpu.pipeline_mode<synchronous>, transform_indices = @transform_5, window_bounds = array<i64: 4, 128>}, {pipeline_mode = #tpu.pipeline_mode<synchronous>, transform_indices = @transform_6, window_bounds = array<i64: 4, 1>}, {transform_indices = @transform_7, window_bounds = array<i64: 1, 4, 8>}]} {
    %0 = tpu.iota {dimensions = array<i32: 1>} : vector<1x8x1xi32>
    %c0_i32 = arith.constant 0 : i32
    %1 = vector.broadcast %c0_i32 : i32 to vector<1x8x1xi32>
    %2 = arith.cmpi ne, %0, %1 : vector<1x8x1xi32>
    %3 = arith.extui %2 : vector<1x8x1xi1> to vector<1x8x1xi32>
    %4 = arith.sitofp %3 : vector<1x8x1xi32> to vector<1x8x1xf32>
    %5 = vector.shape_cast %4 : vector<1x8x1xf32> to vector<8x1xf32>
    %c7_i32 = arith.constant 7 : i32
    %6 = vector.broadcast %c7_i32 : i32 to vector<1x8x1xi32>
    %7 = arith.cmpi ne, %0, %6 : vector<1x8x1xi32>
    %8 = arith.extui %7 : vector<1x8x1xi1> to vector<1x8x1xi32>
    %9 = arith.sitofp %8 : vector<1x8x1xi32> to vector<1x8x1xf32>
    %10 = vector.shape_cast %9 : vector<1x8x1xf32> to vector<8x1xf32>
    %11 = tpu.iota {dimensions = array<i32: 1>} : vector<1x8x1xi32>
    %c7_i32_0 = arith.constant 7 : i32
    %12 = vector.broadcast %c7_i32_0 : i32 to vector<1x8x1xi32>
    %13 = arith.cmpi eq, %11, %12 : vector<1x8x1xi32>
    %14 = arith.extui %13 : vector<1x8x1xi1> to vector<1x8x1xi32>
    %15 = arith.sitofp %14 : vector<1x8x1xi32> to vector<1x8x1xf32>
    %c0 = arith.constant 0 : index
    %c0_1 = arith.constant 0 : index
    %16 = vector.load %arg1[%c0, %c0_1] : memref<8x4xf32, #tpu.memory_space<vmem>>, vector<8x4xf32>
    %c0_2 = arith.constant 0 : index
    %c0_3 = arith.constant 0 : index
    %17 = vector.load %arg2[%c0_2, %c0_3] : memref<4x256xf32, #tpu.memory_space<vmem>>, vector<4x256xf32>
    %cst = arith.constant dense<0.000000e+00> : vector<8x256xf32>
    %18 = tpu.matmul %16, %17, %cst {dimension_numbers = #tpu.dot_dimension_numbers<[1], [0], [0], [1], [0, 0, 1, 1], [], []>} : vector<8x4xf32>, vector<4x256xf32>, vector<8x256xf32> -> vector<8x256xf32>
    %c0_4 = arith.constant 0 : index
    %c0_5 = arith.constant 0 : index
    %19 = vector.load %arg3[%c0_4, %c0_5] : memref<1x256xf32, #tpu.memory_space<vmem>>, vector<1x256xf32>
    %20 = vector.broadcast %19 : vector<1x256xf32> to vector<8x256xf32>
    %21 = arith.addf %18, %20 : vector<8x256xf32>
    %22 = vector.extract_strided_slice %21 {offsets = [0, 0], sizes = [8, 128], strides = [1, 1]} : vector<8x256xf32> to vector<8x128xf32>
    %23 = vector.shape_cast %22 : vector<8x128xf32> to vector<1x8x128xf32>
    %24 = vector.extract_strided_slice %21 {offsets = [0, 128], sizes = [8, 128], strides = [1, 1]} : vector<8x256xf32> to vector<8x128xf32>
    %25 = vector.shape_cast %24 : vector<8x128xf32> to vector<1x8x128xf32>
    %26 = vector.extract_strided_slice %23 {offsets = [0, 7, 0], sizes = [1, 1, 128], strides = [1, 1, 1]} : vector<1x8x128xf32> to vector<1x1x128xf32>
    %27 = vector.broadcast %26 : vector<1x1x128xf32> to vector<1x8x128xf32>
    %28 = arith.mulf %23, %27 : vector<1x8x128xf32>
    %cst_6 = arith.constant dense<0.000000e+00> : vector<1x8xf32>
    %29 = vector.multi_reduction <add>, %28, %cst_6 [2] : vector<1x8x128xf32> to vector<1x8xf32>
    %30 = vector.shape_cast %29 : vector<1x8xf32> to vector<1x8x1xf32>
    %31 = arith.mulf %23, %23 : vector<1x8x128xf32>
    %cst_7 = arith.constant dense<0.000000e+00> : vector<1x8xf32>
    %32 = vector.multi_reduction <add>, %31, %cst_7 [2] : vector<1x8x128xf32> to vector<1x8xf32>
    %33 = vector.shape_cast %32 : vector<1x8xf32> to vector<1x8x1xf32>
    %34 = arith.mulf %26, %26 : vector<1x1x128xf32>
    %cst_8 = arith.constant dense<0.000000e+00> : vector<1x1xf32>
    %35 = vector.multi_reduction <add>, %34, %cst_8 [2] : vector<1x1x128xf32> to vector<1x1xf32>
    %36 = vector.shape_cast %35 : vector<1x1xf32> to vector<1x1x1xf32>
    %cst_9 = arith.constant 1.000000e-16 : f32
    %37 = vector.broadcast %cst_9 : f32 to vector<1x8x1xf32>
    %38 = arith.maximumf %33, %37 : vector<1x8x1xf32>
    %cst_10 = arith.constant 1.000000e-16 : f32
    %39 = vector.broadcast %cst_10 : f32 to vector<1x1x1xf32>
    %40 = arith.maximumf %36, %39 : vector<1x1x1xf32>
    %41 = vector.broadcast %40 : vector<1x1x1xf32> to vector<1x8x1xf32>
    %42 = arith.mulf %38, %41 : vector<1x8x1xf32>
    %43 = math.rsqrt %42 : vector<1x8x1xf32>
    %44 = arith.mulf %30, %43 : vector<1x8x1xf32>
    %45 = math.exp %44 : vector<1x8x1xf32>
    %46 = vector.broadcast %45 : vector<1x8x1xf32> to vector<1x8x128xf32>
    %47 = arith.mulf %46, %25 : vector<1x8x128xf32>
    %cst_11 = arith.constant dense<0.000000e+00> : vector<1x128xf32>
    %48 = vector.multi_reduction <add>, %47, %cst_11 [1] : vector<1x8x128xf32> to vector<1x128xf32>
    %49 = vector.shape_cast %48 : vector<1x128xf32> to vector<1x1x128xf32>
    %cst_12 = arith.constant dense<0.000000e+00> : vector<1x1xf32>
    %50 = vector.multi_reduction <add>, %45, %cst_12 [1] : vector<1x8x1xf32> to vector<1x1xf32>
    %51 = vector.shape_cast %50 : vector<1x1xf32> to vector<1x1x1xf32>
    %52 = tpu.reciprocal %51 : vector<1x1x1xf32> -> vector<1x1x1xf32>
    %53 = vector.broadcast %52 : vector<1x1x1xf32> to vector<1x1x128xf32>
    %54 = arith.mulf %49, %53 : vector<1x1x128xf32>
    %55 = vector.broadcast %15 : vector<1x8x1xf32> to vector<1x8x128xf32>
    %56 = vector.broadcast %54 : vector<1x1x128xf32> to vector<1x8x128xf32>
    %57 = arith.mulf %55, %56 : vector<1x8x128xf32>
    %58 = arith.addf %25, %57 : vector<1x8x128xf32>
    %59 = vector.shape_cast %58 : vector<1x8x128xf32> to vector<8x128xf32>
    %cst_13 = arith.constant 0.000000e+00 : f32
    %60 = vector.broadcast %cst_13 : f32 to vector<8x128xf32>
    %61 = arith.maximumf %59, %60 : vector<8x128xf32>
    %c1_i32 = arith.constant 1 : i32
    %62 = tpu.dynamic_rotate %61 by %c1_i32 dim 0 : vector<8x128xf32>, i32 -> vector<8x128xf32>
    %63 = vector.broadcast %5 : vector<8x1xf32> to vector<8x128xf32>
    %64 = arith.mulf %62, %63 : vector<8x128xf32>
    %c7_i32_14 = arith.constant 7 : i32
    %65 = tpu.dynamic_rotate %61 by %c7_i32_14 dim 0 : vector<8x128xf32>, i32 -> vector<8x128xf32>
    %66 = vector.broadcast %10 : vector<8x1xf32> to vector<8x128xf32>
    %67 = arith.mulf %65, %66 : vector<8x128xf32>
    %c0_15 = arith.constant 0 : index
    %c0_16 = arith.constant 0 : index
    %c0_17 = arith.constant 0 : index
    %68 = vector.load %arg4[%c0_15, %c0_16, %c0_17] : memref<3x128x256xf32, #tpu.memory_space<vmem>>, vector<1x128x256xf32>
    %69 = vector.shape_cast %68 : vector<1x128x256xf32> to vector<128x256xf32>
    %cst_18 = arith.constant dense<0.000000e+00> : vector<8x256xf32>
    %70 = tpu.matmul %64, %69, %cst_18 {dimension_numbers = #tpu.dot_dimension_numbers<[1], [0], [0], [1], [0, 0, 1, 1], [], []>} : vector<8x128xf32>, vector<128x256xf32>, vector<8x256xf32> -> vector<8x256xf32>
    %c1 = arith.constant 1 : index
    %c0_19 = arith.constant 0 : index
    %c0_20 = arith.constant 0 : index
    %71 = vector.load %arg4[%c1, %c0_19, %c0_20] : memref<3x128x256xf32, #tpu.memory_space<vmem>>, vector<1x128x256xf32>
    %72 = vector.shape_cast %71 : vector<1x128x256xf32> to vector<128x256xf32>
    %cst_21 = arith.constant dense<0.000000e+00> : vector<8x256xf32>
    %73 = tpu.matmul %61, %72, %cst_21 {dimension_numbers = #tpu.dot_dimension_numbers<[1], [0], [0], [1], [0, 0, 1, 1], [], []>} : vector<8x128xf32>, vector<128x256xf32>, vector<8x256xf32> -> vector<8x256xf32>
    %74 = arith.addf %70, %73 : vector<8x256xf32>
    %c2 = arith.constant 2 : index
    %c0_22 = arith.constant 0 : index
    %c0_23 = arith.constant 0 : index
    %75 = vector.load %arg4[%c2, %c0_22, %c0_23] : memref<3x128x256xf32, #tpu.memory_space<vmem>>, vector<1x128x256xf32>
    %76 = vector.shape_cast %75 : vector<1x128x256xf32> to vector<128x256xf32>
    %cst_24 = arith.constant dense<0.000000e+00> : vector<8x256xf32>
    %77 = tpu.matmul %67, %76, %cst_24 {dimension_numbers = #tpu.dot_dimension_numbers<[1], [0], [0], [1], [0, 0, 1, 1], [], []>} : vector<8x128xf32>, vector<128x256xf32>, vector<8x256xf32> -> vector<8x256xf32>
    %78 = arith.addf %74, %77 : vector<8x256xf32>
    %c0_25 = arith.constant 0 : index
    %c0_26 = arith.constant 0 : index
    %79 = vector.load %arg5[%c0_25, %c0_26] : memref<1x256xf32, #tpu.memory_space<vmem>>, vector<1x256xf32>
    %80 = vector.broadcast %79 : vector<1x256xf32> to vector<8x256xf32>
    %81 = arith.addf %78, %80 : vector<8x256xf32>
    %82 = vector.extract_strided_slice %81 {offsets = [0, 0], sizes = [8, 128], strides = [1, 1]} : vector<8x256xf32> to vector<8x128xf32>
    %83 = vector.shape_cast %82 : vector<8x128xf32> to vector<1x8x128xf32>
    %84 = vector.extract_strided_slice %81 {offsets = [0, 128], sizes = [8, 128], strides = [1, 1]} : vector<8x256xf32> to vector<8x128xf32>
    %85 = vector.shape_cast %84 : vector<8x128xf32> to vector<1x8x128xf32>
    %86 = vector.extract_strided_slice %83 {offsets = [0, 7, 0], sizes = [1, 1, 128], strides = [1, 1, 1]} : vector<1x8x128xf32> to vector<1x1x128xf32>
    %87 = vector.broadcast %86 : vector<1x1x128xf32> to vector<1x8x128xf32>
    %88 = arith.mulf %83, %87 : vector<1x8x128xf32>
    %cst_27 = arith.constant dense<0.000000e+00> : vector<1x8xf32>
    %89 = vector.multi_reduction <add>, %88, %cst_27 [2] : vector<1x8x128xf32> to vector<1x8xf32>
    %90 = vector.shape_cast %89 : vector<1x8xf32> to vector<1x8x1xf32>
    %91 = arith.mulf %83, %83 : vector<1x8x128xf32>
    %cst_28 = arith.constant dense<0.000000e+00> : vector<1x8xf32>
    %92 = vector.multi_reduction <add>, %91, %cst_28 [2] : vector<1x8x128xf32> to vector<1x8xf32>
    %93 = vector.shape_cast %92 : vector<1x8xf32> to vector<1x8x1xf32>
    %94 = arith.mulf %86, %86 : vector<1x1x128xf32>
    %cst_29 = arith.constant dense<0.000000e+00> : vector<1x1xf32>
    %95 = vector.multi_reduction <add>, %94, %cst_29 [2] : vector<1x1x128xf32> to vector<1x1xf32>
    %96 = vector.shape_cast %95 : vector<1x1xf32> to vector<1x1x1xf32>
    %cst_30 = arith.constant 1.000000e-16 : f32
    %97 = vector.broadcast %cst_30 : f32 to vector<1x8x1xf32>
    %98 = arith.maximumf %93, %97 : vector<1x8x1xf32>
    %cst_31 = arith.constant 1.000000e-16 : f32
    %99 = vector.broadcast %cst_31 : f32 to vector<1x1x1xf32>
    %100 = arith.maximumf %96, %99 : vector<1x1x1xf32>
    %101 = vector.broadcast %100 : vector<1x1x1xf32> to vector<1x8x1xf32>
    %102 = arith.mulf %98, %101 : vector<1x8x1xf32>
    %103 = math.rsqrt %102 : vector<1x8x1xf32>
    %104 = arith.mulf %90, %103 : vector<1x8x1xf32>
    %105 = math.exp %104 : vector<1x8x1xf32>
    %106 = vector.broadcast %105 : vector<1x8x1xf32> to vector<1x8x128xf32>
    %107 = arith.mulf %106, %85 : vector<1x8x128xf32>
    %cst_32 = arith.constant dense<0.000000e+00> : vector<1x128xf32>
    %108 = vector.multi_reduction <add>, %107, %cst_32 [1] : vector<1x8x128xf32> to vector<1x128xf32>
    %109 = vector.shape_cast %108 : vector<1x128xf32> to vector<1x1x128xf32>
    %cst_33 = arith.constant dense<0.000000e+00> : vector<1x1xf32>
    %110 = vector.multi_reduction <add>, %105, %cst_33 [1] : vector<1x8x1xf32> to vector<1x1xf32>
    %111 = vector.shape_cast %110 : vector<1x1xf32> to vector<1x1x1xf32>
    %112 = tpu.reciprocal %111 : vector<1x1x1xf32> -> vector<1x1x1xf32>
    %113 = vector.broadcast %112 : vector<1x1x1xf32> to vector<1x1x128xf32>
    %114 = arith.mulf %109, %113 : vector<1x1x128xf32>
    %115 = vector.broadcast %15 : vector<1x8x1xf32> to vector<1x8x128xf32>
    %116 = vector.broadcast %114 : vector<1x1x128xf32> to vector<1x8x128xf32>
    %117 = arith.mulf %115, %116 : vector<1x8x128xf32>
    %118 = arith.addf %85, %117 : vector<1x8x128xf32>
    %119 = vector.shape_cast %118 : vector<1x8x128xf32> to vector<8x128xf32>
    %cst_34 = arith.constant 0.000000e+00 : f32
    %120 = vector.broadcast %cst_34 : f32 to vector<8x128xf32>
    %121 = arith.maximumf %119, %120 : vector<8x128xf32>
    %c0_35 = arith.constant 0 : index
    %c0_36 = arith.constant 0 : index
    %122 = vector.load %arg6[%c0_35, %c0_36] : memref<4x128xf32, #tpu.memory_space<vmem>>, vector<4x128xf32>
    %cst_37 = arith.constant dense<0.000000e+00> : vector<4x8xf32>
    %123 = tpu.matmul %122, %121, %cst_37 {dimension_numbers = #tpu.dot_dimension_numbers<[1], [1], [0], [0], [0, 0, 1, 0], [], []>} : vector<4x128xf32>, vector<8x128xf32>, vector<4x8xf32> -> vector<4x8xf32>
    %c0_38 = arith.constant 0 : index
    %c0_39 = arith.constant 0 : index
    %124 = vector.load %arg7[%c0_38, %c0_39] : memref<4x1xf32, #tpu.memory_space<vmem>>, vector<4x1xf32>
    %125 = vector.broadcast %124 : vector<4x1xf32> to vector<4x8xf32>
    %126 = arith.addf %123, %125 : vector<4x8xf32>
    %c0_40 = arith.constant 0 : index
    %c0_41 = arith.constant 0 : index
    %c0_42 = arith.constant 0 : index
    %127 = vector.load %arg8[%c0_40, %c0_41, %c0_42] : memref<1x4x8xf32, #tpu.memory_space<vmem>>, vector<1x4x8xf32>
    %128 = vector.shape_cast %127 : vector<1x4x8xf32> to vector<4x8xf32>
    %129 = vector.shape_cast %126 : vector<4x8xf32> to vector<1x4x8xf32>
    tpu.vector_store %arg8[%c0_40, %c0_41, %c0_42], %129 {strides = array<i32>} : memref<1x4x8xf32, #tpu.memory_space<vmem>>, vector<1x4x8xf32>,
    return
  }
  func.func @transform_0(%arg0: i32) -> (i32, i32) {
    %c0_i32 = arith.constant 0 : i32
    %c0_i32_0 = arith.constant 0 : i32
    return %arg0, %c0_i32 : i32, i32
  }
  func.func @transform_1(%arg0: i32) -> (i32, i32) {
    %c0_i32 = arith.constant 0 : i32
    %c0_i32_0 = arith.constant 0 : i32
    %c0_i32_1 = arith.constant 0 : i32
    return %c0_i32, %c0_i32_0 : i32, i32
  }
  func.func @transform_2(%arg0: i32) -> (i32, i32) {
    %c0_i32 = arith.constant 0 : i32
    %c0_i32_0 = arith.constant 0 : i32
    %c0_i32_1 = arith.constant 0 : i32
    return %c0_i32, %c0_i32_0 : i32, i32
  }
  func.func @transform_3(%arg0: i32) -> (i32, i32, i32) {
    %c0_i32 = arith.constant 0 : i32
    %c0_i32_0 = arith.constant 0 : i32
    %c0_i32_1 = arith.constant 0 : i32
    %c0_i32_2 = arith.constant 0 : i32
    return %c0_i32, %c0_i32_0, %c0_i32_1 : i32, i32, i32
  }
  func.func @transform_4(%arg0: i32) -> (i32, i32) {
    %c0_i32 = arith.constant 0 : i32
    %c0_i32_0 = arith.constant 0 : i32
    %c0_i32_1 = arith.constant 0 : i32
    return %c0_i32, %c0_i32_0 : i32, i32
  }
  func.func @transform_5(%arg0: i32) -> (i32, i32) {
    %c0_i32 = arith.constant 0 : i32
    %c0_i32_0 = arith.constant 0 : i32
    %c0_i32_1 = arith.constant 0 : i32
    return %c0_i32, %c0_i32_0 : i32, i32
  }
  func.func @transform_6(%arg0: i32) -> (i32, i32) {
    %c0_i32 = arith.constant 0 : i32
    %c0_i32_0 = arith.constant 0 : i32
    %c0_i32_1 = arith.constant 0 : i32
    return %c0_i32, %c0_i32_0 : i32, i32
  }
  func.func @transform_7(%arg0: i32) -> (i32, i32, i32) {
    %c0_i32 = arith.constant 0 : i32
    %c0_i32_0 = arith.constant 0 : i32
    %c0_i32_1 = arith.constant 0 : i32
    return %arg0, %c0_i32, %c0_i32_0 : i32, i32, i32
  }
}

</mosaic_0001>

<bundles_post_ra>
// kernel: tpu_custom_call.1
= control target key start
LH: loop header
LB: loop body
LE: loop exit
PB: predicated region body
PF: predicated region fallthrough
CT: control target
= control target key end

     0   :  { %12 = vsyncpa [#allocation3], 0  ;;  %s1512_s0 = inlined_call_operand.vmem [shape: f32[16,4], index: 0, kind: input, shape index: {}]   ;;  %s1513_s1 = inlined_call_operand.vmem [shape: f32[4,256], index: 1, kind: input, shape index: {}]   ;;  %s1514_s2 = inlined_call_operand.vmem [shape: f32[1,256], index: 2, kind: input, shape index: {}]   ;;  %s1515_s3 = inlined_call_operand.hbm [shape: f32[3,128,256], index: 3, kind: input, shape index: {}]   ;;  %s1516_s4 = inlined_call_operand.vmem [shape: f32[1,256], index: 4, kind: input, shape index: {}]   ;;  %s1517_s5 = inlined_call_operand.vmem [shape: f32[4,128], index: 5, kind: input, shape index: {}]   ;;  %s1518_s6 = inlined_call_operand.vmem [shape: f32[4,1], index: 6, kind: input, shape index: {}]   ;;  %s1519_s7 = inlined_call_operand.hbm [shape: f32[2,4,8], index: 7, kind: output, shape index: {}]  }
   0x1   :  { %13 = vsyncpa [#allocation4], 0 }
   0x2   :  { %15 = vsyncpa [#allocation4 + $0x1], 0  ;;  %s1313_s24 = smov 0   ;;  %s1315_s25 = smov 0  }
   0x3   :  { %s1317_s26 = smov 0   ;;  %s1319_s27 = smov 0  }
   0x4 LB: > { %s1334_s28 = sadd.s32 4294967295, %s1264_s27   ;;  %s976_s29 = sadd.s32 4294967294, %s1264_s27   ;;  %s1264_s27 = sphi %s1319_s27, %s1535_s27   ;;  %s1260_s26 = sphi %s1317_s26, %s1534_s26   ;;  %s1256_s25 = sphi %s1315_s25, %s1533_s25   ;;  %s1252_s24 = sphi %s1313_s24, %s1532_s24  }
   0x5   : > { %s1338_s30 = sadd.s32 1, %s1264_s27   ;;  %s180_s8 = sadd.s32 1, %s1260_s26 }
   0x6   : > { %s177_s9 = ssub.s32 %s1264_s27, %s1338_s30  ;;  %p190_p0 = scmp.ne.s32.totalorder %s1260_s26, %s1256_s25 }
   0x7   : > { %p178_p1 = scmp.eq.s32.totalorder %s177_s9, 0  ;;  %p191_p2 = scmp.eq.s32.totalorder %s1334_s28, 1 }
   0x8   : > { %p196_p3 = scmp.ne.s32.totalorder %s1256_s25, %s1252_s24  ;;  %p197_p4 = scmp.eq.s32.totalorder %s976_s29, 1 }
   0x9   : > { %s1349_s10 = scalar_select %p178_p1, %s1260_s26, %s180_s8  }
   0xa   : > { %p1351_p5 = por %p191_p2, %p190_p0  ;;  %p1355_p6 = por %p197_p4, %p196_p3 }
   0xb   : > { %p977_p7 = scmp.ge.s32.totalorder %s1264_s27, 1  ;;  %p204_p8 = scmp.lt.s32.totalorder %s1264_s27, 3 }
   0xc   : > { %s1523_s11 = scalar_select %p1351_p5, 1, 0 }
   0xd   : > { %s1524_s12 = scalar_select %p1355_p6, 1, 0 }
   0xe   : > { %p1520_p9 = scmp.eq.s32.totalorder %s1334_s28, 0  ;;  %p1362_p10 = pnand %p977_p7, %p204_p8 }
   0xf   : > { %s1266_s14 = smov [#allocation2]   ;;  %s1170_s19 = scalar_lea.hbm %s1515_s3, 12288 }
  0x10   : > { %s1525_s13 = scalar_select %p1362_p10, 1, 0 }
  0x11   : > { %s222_s15 = sshll.u32 %s1266_s14, 4  ;;  %p1107_p11 = pneg %p1362_p10  ;;  %s223_s15 = int_to_ptr.vmem [resolvable:$true] %s222_s15 }
  0x12   : > { %p1171_p13 = scmp.ne.s32.totalorder %s1515_s3, %s1170_s19  ;;  %p1177_p3 = scmp.lt.u32.totalorder %s1170_s19, %s1515_s3 }
  0x13   : > { %p1370_p12 = pnand %p1520_p9, %p1107_p11 }
  0x15   : > { %p1172_p0 = pneg %p1370_p12 }
  0x17   : > { %p1173_p1 = pnand %p1172_p0, %p1171_p13 }
  0x19   : > { %p1174_p2 = pneg %p1173_p1 }
  0x1b   : > { %p1179_p4 = pnand %p1177_p3, %p1174_p2 }
  0x1d   : > { %1182 = shalt.err (!%p1179_p4)
}
  0x1e   : > { %s1183_s29 = scalar_lea.vmem %s223_s15, 12288  ;;  %p1191_p9 = scmp.lt.s32.totalorder %s223_s15, %s223_s15 }
  0x1f   : > { %p1184_p7 = scmp.ne.s32.totalorder %s223_s15, %s1183_s29  ;;  %p1192_p6 = scmp.lt.s32.totalorder %s1183_s29, %s1183_s29 }
  0x21   : > { %p1186_p8 = pnand %p1184_p7, %p1172_p0  ;;  %p1193_p5 = por %p1192_p6, %p1191_p9 }
  0x23   : > { %p1187_p11 = pneg %p1186_p8 }
  0x25   : > { %p1194_p10 = pnand %p1193_p5, %p1187_p11 }
  0x27   : > { %1197 = shalt.err (!%p1194_p10)
}
  0x28   : > { %s1267_s8 = smov 256   ;;  %s1268_s9 = smov 16  }
  0x29   : > { %1110 = dma.hbm_to_vmem [thread:$0]  (!%p1370_p12), %s1515_s3, 12288, %s223_s15, [#allocation3], %s1267_s8, %s1267_s8, %s1268_s9  }
  0x2a   : > { %p1527_p13 = scmp.ne.s32.totalorder %s1525_s13, 0 }
  0x2b   : > { %p1528_p1 = scmp.eq.s32.totalorder (!%p1527_p13), %s1334_s28, 0 }
  0x2c   : > { %254 = sbr.rel (%p1527_p13) target bundleno = 1174 (0x496), region = 48 }
  0x33   : > { %1243 = dma.done.wait (%p1528_p1), [#allocation3], 12288   ;;  %p1529_p0 = pmov %p1528_p1 }
  0x34   : > { %p285_p5 = scmp.lt.s32.totalorder %s1334_s28, 1  ;;  %v1269_v0 = vmov 0.0   ;;  %v301_v1 = vld [vmem:[%s1513_s1] sm:$0xff]  ;;  %vm320_vm0 = vcmask 1043456   ;;  %vm316_vm1 = vcmask 31744   ;;  %v289_v4 = vlaneseq  ;;  %v477_v17 = vld [vmem:[#allocation2 + $0x108] sm:$0xff] }
  0x35   : > { %1245 = vsyncadd (%p1529_p0), [#allocation3], 4294955008  ;;  %389 = vmatprep.mubr.f32.mxu0 %v1269_v0  ;;  %643 = vmatprep.mubr.f32.mxu1 %v1269_v0  ;;  %v315_v2 = vcombine.high %v301_v1, %v301_v1  ;;  %v1413_v7 = vld [vmem:[%s1514_s2] sm:$0x3]  ;;  %vm406_vm2 = vcmask 1047559   ;;  %v479_v18 = vld [vmem:[#allocation2 + $0x118] sm:$0xff] }
  0x36   : > { %s286_s16 = scalar_select %p285_p5, %s1334_s28, 1  ;;  %v1407_v5 = vshrl.u32 %v289_v4, 7  ;;  %v476_v19 = vld [vmem:[#allocation2 + $0x100] sm:$0xff]  ;;  %v1001_v20 = vpack.c.bf16 %v479_v18, %v477_v17  ;;  %v478_v21 = vld [vmem:[#allocation2 + $0x110] sm:$0xff]  ;;  %v444_v22 = vld [vmem:[#allocation2 + $0x8] sm:$0xff]  ;;  %vm1270_vm6 = vmmov 0  }
  0x37   : > { %987 = vmatprep.subr.msk.mxu0 %vm320_vm0, %v315_v2  ;;  %v446_v23 = vld [vmem:[#allocation2 + $0x18] sm:$0xff]  ;;  %v1003_v24 = vpack.c.bf16 %v478_v21, %v476_v19  ;;  %v481_v26 = vld [vmem:[#allocation2 + $0x128] sm:$0xff]  ;;  %v443_v28 = vld [vmem:[#allocation2] sm:$0xff]  ;;  %s991_s19 = sshll.u32 %s1334_s28, 6  ;;  %vm889_vm7 = vcmask 60416   ;;  %p1530_p9 = scmp.ne.s32.totalorder %s1523_s11, 0 }
  0x38   : > { %s983_s18 = sshll.u32 %s286_s16, 3  ;;  %988 = vmatpush1.msk.msra.mxu0 %vm320_vm0, %v301_v1  ;;  %v306_v6 = vsub.s32 0, %v1407_v5  ;;  %v1419_v9 = vsub.s32 7, %v1407_v5  ;;  %v1033_v25 = vpack.c.bf16 %v446_v23, %v444_v22  ;;  %v483_v27 = vld [vmem:[#allocation2 + $0x138] sm:$0xff]  ;;  %v445_v30 = vld [vmem:[#allocation2 + $0x10] sm:$0xff]  ;;  %v480_v31 = vld [vmem:[#allocation2 + $0x120] sm:$0xff]  ;;  %s1470_s23 = scalar_lea.hbm %s1519_s7, %s991_s19 }
  0x39   : > { %s288_s13 = scalar_lea.vmem %s1512_s0, %s983_s18  ;;  %1002 = vmatprep.subr.bf16.mxu0 %v1001_v20  ;;  %v1005_v29 = vpack.c.bf16 %v483_v27, %v481_v26  ;;  %v482_v32 = vld [vmem:[#allocation2 + $0x130] sm:$0xff]  ;;  %v1035_v33 = vpack.c.bf16 %v445_v30, %v443_v28  ;;  %v448_v35 = vld [vmem:[#allocation2 + $0x28] sm:$0xff]  ;;  %v450_v36 = vld [vmem:[#allocation2 + $0x38] sm:$0xff]  ;;  %vm297_vm3 = vcmp.eq.s32.totalorder %v1407_v5, 7  ;;  %vm291_vm4 = vcmp.ne.s32.totalorder %v1407_v5, 0  ;;  %s282_s18 = sand.u32 1, %s1256_s25  }
  0x3a   : > { %v300_v3 = vld [vmem:[%s288_s13] sm:$0xff]  ;;  %v307_v8 = vrot.slane %v1413_v7, %v306_v6  ;;  %1034 = vmatprep.subr.bf16.mxu1 %v1033_v25  ;;  %v1007_v34 = vpack.c.bf16 %v482_v32, %v480_v31  ;;  %v485_v37 = vld [vmem:[#allocation2 + $0x148] sm:$0xff]  ;;  %v1037_v38 = vpack.c.bf16 %v450_v36, %v448_v35  ;;  %v487_v39 = vld [vmem:[#allocation2 + $0x158] sm:$0xff]  ;;  %vm294_vm5 = vcmp.ne.s32.totalorder %v1407_v5, 7  ;;  %s982_s15 = sshll.u32 %s282_s18, 2  ;;  %s892_s29 = scalar_lea.sflag [#allocation4], %s282_s18 }
  0x3b   : > { %989 = vmatmul.mubr.msk.f32.vlgmr.msra.gmra.mrb[0].mxu0 %vm316_vm1, %v300_v3  ;;  %v447_v40 = vld [vmem:[#allocation2 + $0x20] sm:$0xff]  ;;  %v449_v41 = vld [vmem:[#allocation2 + $0x30] sm:$0xff]  ;;  %1036 = vmatpush1.bf16.msra.mxu1 %v1035_v33  ;;  %v1009_v42 = vpack.c.bf16 %v487_v39, %v485_v37  ;;  %v452_v46 = vld [vmem:[#allocation2 + $0x48] sm:$0xff]  ;;  %s284_s13 = scalar_lea.vmem [#allocation5], %s982_s15  ;;  %s1272_s28 = smov [#allocation5]  }
  0x3c   : > { %572 = vmatprep.mubr.f32.mxu0 %v1269_v0  ;;  %1004 = vmatpush1.bf16.msra.mxu0 %v1003_v24  ;;  %v1039_v43 = vpack.c.bf16 %v449_v41, %v447_v40  ;;  %v484_v44 = vld [vmem:[#allocation2 + $0x140] sm:$0xff]  ;;  %v486_v45 = vld [vmem:[#allocation2 + $0x150] sm:$0xff]  ;;  %v454_v47 = vld [vmem:[#allocation2 + $0x58] sm:$0xff]  ;;  %s905_s20 = sshll.u32 %s284_s13, 4  ;;  %s1202_s9 = sshll.u32 %s1272_s28, 4  ;;  %s1472_s20 = int_to_ptr.vmem [resolvable:$true] %s905_s20  ;;  %s1203_s9 = int_to_ptr.vmem [resolvable:$false] %s1202_s9 }
  0x3d   : > { %1006 = vmatprep.subr.bf16.mxu0 %v1005_v29  ;;  %1038 = vmatprep.subr.bf16.mxu1 %v1037_v38  ;;  %v489_v48 = vld [vmem:[#allocation2 + $0x168] sm:$0xff]  ;;  %v491_v49 = vld [vmem:[#allocation2 + $0x178] sm:$0xff]  ;;  %v1011_v50 = vpack.c.bf16 %v486_v45, %v484_v44  ;;  %v1041_v51 = vpack.c.bf16 %v454_v47, %v452_v46  ;;  %v451_v52 = vld [vmem:[#allocation2 + $0x40] sm:$0xff]  ;;  %s1198_s8 = scalar_lea.vmem %s1472_s20, 64  ;;  %s1204_s14 = scalar_lea.vmem %s1203_s9, 128 }
  0x3e   : > { %v453_v53 = vld [vmem:[#allocation2 + $0x50] sm:$0xff]  ;;  %v488_v54 = vld [vmem:[#allocation2 + $0x160] sm:$0xff]  ;;  %v1013_v55 = vpack.c.bf16 %v491_v49, %v489_v48  ;;  %v456_v57 = vld [vmem:[#allocation2 + $0x68] sm:$0xff]  ;;  %p1199_p6 = scmp.ne.s32.totalorder %s1472_s20, %s1198_s8  ;;  %p1205_p2 = scmp.lt.s32.totalorder %s1472_s20, %s1203_s9 }
  0x3f   : > { %v490_v56 = vld [vmem:[#allocation2 + $0x170] sm:$0xff]  ;;  %v458_v58 = vld [vmem:[#allocation2 + $0x78] sm:$0xff]  ;;  %1040 = vmatpush1.bf16.msra.mxu1 %v1039_v43  ;;  %v1043_v59 = vpack.c.bf16 %v453_v53, %v451_v52  ;;  %v493_v60 = vld [vmem:[#allocation2 + $0x188] sm:$0xff]  ;;  %p1206_p3 = scmp.lt.s32.totalorder %s1204_s14, %s1198_s8 }
  0x40   : > { %1008 = vmatpush1.bf16.msra.mxu0 %v1007_v34  ;;  %v495_v61 = vld [vmem:[#allocation2 + $0x198] sm:$0xff]  ;;  %1042 = vmatprep.subr.bf16.mxu1 %v1041_v51  ;;  %v1045_v62 = vpack.c.bf16 %v458_v58, %v456_v57  ;;  %v455_v63 = vld [vmem:[#allocation2 + $0x60] sm:$0xff]  ;;  %v457_v1 = vld [vmem:[#allocation2 + $0x70] sm:$0xff]  ;;  %v1015_v2 = vpack.c.bf16 %v490_v56, %v488_v54  ;;  %p1200_p10 = pnand %p1199_p6, %p1530_p9 }
  0x41   : > { %1010 = vmatprep.subr.bf16.mxu0 %v1009_v42  ;;  %v460_v3 = vld [vmem:[#allocation2 + $0x88] sm:$0xff]  ;;  %v462_v4 = vld [vmem:[#allocation2 + $0x98] sm:$0xff]  ;;  %v459_v17 = vld [vmem:[#allocation2 + $0x80] sm:$0xff]  ;;  %p1207_p4 = por %p1206_p3, %p1205_p2 }
  0x42   : > { %v461_v18 = vld [vmem:[#allocation2 + $0x90] sm:$0xff]  ;;  %v464_v20 = vld [vmem:[#allocation2 + $0xa8] sm:$0xff]  ;;  %v466_v21 = vld [vmem:[#allocation2 + $0xb8] sm:$0xff]  ;;  %p1201_p12 = pneg %p1200_p10 }
  0x43   : > { %1044 = vmatpush1.bf16.msra.mxu1 %v1043_v59  ;;  %v496_v23 = vld [vmem:[#allocation2 + $0x1a0] sm:$0xff]  ;;  %v498_v24 = vld [vmem:[#allocation2 + $0x1b0] sm:$0xff]  ;;  %v1051_v25 = vpack.c.bf16 %v461_v18, %v459_v17  ;;  %v501_v26 = vld [vmem:[#allocation2 + $0x1c8] sm:$0xff]  ;;  %v1053_v28 = vpack.c.bf16 %v466_v21, %v464_v20 }
  0x44   : > { %1012 = vmatpush1.bf16.msra.mxu0 %v1011_v50  ;;  %1046 = vmatprep.subr.bf16.mxu1 %v1045_v62  ;;  %v503_v27 = vld [vmem:[#allocation2 + $0x1d8] sm:$0xff]  ;;  %v463_v29 = vld [vmem:[#allocation2 + $0xa0] sm:$0xff]  ;;  %v465_v30 = vld [vmem:[#allocation2 + $0xb0] sm:$0xff]  ;;  %v1023_v31 = vpack.c.bf16 %v498_v24, %v496_v23  ;;  %p1208_p7 = pnand %p1207_p4, %p1201_p12 }
  0x45   : > { %1014 = vmatprep.subr.bf16.mxu0 %v1013_v55  ;;  %v468_v32 = vld [vmem:[#allocation2 + $0xc8] sm:$0xff]  ;;  %v470_v33 = vld [vmem:[#allocation2 + $0xd8] sm:$0xff]  ;;  %v1025_v34 = vpack.c.bf16 %v503_v27, %v501_v26  ;;  %v500_v35 = vld [vmem:[#allocation2 + $0x1c0] sm:$0xff]  ;;  %v1055_v37 = vpack.c.bf16 %v465_v30, %v463_v29 }
  0x46   : > { %v502_v36 = vld [vmem:[#allocation2 + $0x1d0] sm:$0xff]  ;;  %v505_v38 = vld [vmem:[#allocation2 + $0x1e8] sm:$0xff]  ;;  %v507_v39 = vld [vmem:[#allocation2 + $0x1f8] sm:$0xff]  ;;  %v1057_v40 = vpack.c.bf16 %v470_v33, %v468_v32  ;;  %v984_v33 = vsel %vm291_vm4, 1.0, %v1269_v0 }
  0x47   : > { %v467_v41 = vld [vmem:[#allocation2 + $0xc0] sm:$0xff]  ;;  %v469_v42 = vld [vmem:[#allocation2 + $0xd0] sm:$0xff]  ;;  %v1027_v43 = vpack.c.bf16 %v502_v36, %v500_v35  ;;  %v472_v44 = vld [vmem:[#allocation2 + $0xe8] sm:$0xff]  ;;  %v1029_v46 = vpack.c.bf16 %v507_v39, %v505_v38 }
  0x48   : > { %1016 = vmatpush1.bf16.msra.mxu0 %v1015_v2  ;;  %v474_v45 = vld [vmem:[#allocation2 + $0xf8] sm:$0xff]  ;;  %v504_v47 = vld [vmem:[#allocation2 + $0x1e0] sm:$0xff]  ;;  %v506_v48 = vld [vmem:[#allocation2 + $0x1f0] sm:$0xff]  ;;  %v1059_v49 = vpack.c.bf16 %v469_v42, %v467_v41 }
  0x49   : > { %v1061_v50 = vpack.c.bf16 %v474_v45, %v472_v44  ;;  %v1031_v51 = vpack.c.bf16 %v506_v48, %v504_v47  ;;  %v471_v52 = vld [vmem:[#allocation2 + $0xe0] sm:$0xff]  ;;  %v473_v53 = vld [vmem:[#allocation2 + $0xf0] sm:$0xff]  ;;  %v652_v55 = vld [vmem:[#allocation2 + $0x208] sm:$0xff] }
  0x4a   : > { %v1063_v54 = vpack.c.bf16 %v473_v53, %v471_v52  ;;  %v654_v56 = vld [vmem:[#allocation2 + $0x218] sm:$0xff]  ;;  %v653_v32 = vld [vmem:[#allocation2 + $0x210] sm:$0xff]  ;;  %v660_v42 = vld [vmem:[#allocation2 + $0x248] sm:$0xff] }
  0x4b   : > { %v1065_v57 = vpack.c.bf16 %v654_v56, %v652_v55  ;;  %v658_v35 = vld [vmem:[#allocation2 + $0x238] sm:$0xff]  ;;  %v657_v41 = vld [vmem:[#allocation2 + $0x230] sm:$0xff]  ;;  %v664_v48 = vld [vmem:[#allocation2 + $0x268] sm:$0xff] }
  0x4c   : > { %v661_v47 = vld [vmem:[#allocation2 + $0x250] sm:$0xff]  ;;  %v663_v52 = vld [vmem:[#allocation2 + $0x260] sm:$0xff]  ;;  %v670_v55 = vld [vmem:[#allocation2 + $0x298] sm:$0xff] }
  0x4d   : > { %v665_v53 = vld [vmem:[#allocation2 + $0x270] sm:$0xff] }
  0x4e   : > { %v1079_v56 = vpack.c.bf16 %v665_v53, %v663_v52 }
 0x10e   : > { %v391_v10 = vpop.f32.mrb[0].mxu0 }
 0x10f   : > { %v392_v11 = vadd.f32 %v391_v10, %v307_v8  ;;  %v1421_v12 = vpop.f32.mrb[1].mxu0  ;;  %v1017_v8 = vpack.c.bf16 %v495_v61, %v493_v60  ;;  %v492_v10 = vld [vmem:[#allocation2 + $0x180] sm:$0xff] }
 0x111   : > { %v403_v13 = vmul.f32 %v392_v11, %v392_v11  ;;  %v399_v14 = vrot.slane %v392_v11, %v1419_v9  ;;  %1018 = vmatprep.subr.bf16.mxu0 %v1017_v8  ;;  %v310_v8 = vsub.s32 1, %v1407_v5  ;;  %v813_v5 = vld [vmem:[%s1518_s6] sm:$0xf] }
 0x113   : > { %v407_v15 = vsel %vm406_vm2, %v403_v13, 0.0  ;;  %v400_v16 = vmul.f32 %v399_v14, %v392_v11  ;;  %v494_v11 = vld [vmem:[#allocation2 + $0x190] sm:$0xff]  ;;  %v497_v14 = vld [vmem:[#allocation2 + $0x1a8] sm:$0xff] }
 0x114   : > { %408 = vadd.xlane.f32.xlu0 %v407_v15  ;;  %v499_v15 = vld [vmem:[#allocation2 + $0x1b8] sm:$0xff]  ;;  %v1019_v19 = vpack.c.bf16 %v494_v11, %v492_v10  ;;  %v311_v10 = vrot.slane %v1413_v7, %v310_v8 }
 0x115   : > { %401 = vadd.xlane.f32.xlu1 %v400_v16  ;;  %v1049_v16 = vpack.c.bf16 %v462_v4, %v460_v3  ;;  %v1021_v22 = vpack.c.bf16 %v499_v15, %v497_v14 }
 0x116   : > { %1020 = vmatpush1.bf16.msra.mxu0 %v1019_v19  ;;  %v394_v11 = vadd.f32 %v1421_v12, %v311_v10  ;;  %v1434_v12 = vsel %vm297_vm3, 1.0, %v1269_v0 }
 0x117   : > { %1022 = vmatprep.subr.bf16.mxu0 %v1021_v22 }
 0x118   : > { %404 = vadd.xlane.f32.xlu0 %v403_v13  ;;  %v1047_v13 = vpack.c.bf16 %v457_v1, %v455_v63 }
 0x11a   : > { %1048 = vmatpush1.bf16.msra.mxu1 %v1047_v13  ;;  %1024 = vmatpush1.bf16.msra.mxu0 %v1023_v31  ;;  %v651_v31 = vld [vmem:[#allocation2 + $0x200] sm:$0xff] }
 0x11b   : > { %1050 = vmatprep.subr.bf16.mxu1 %v1049_v16  ;;  %1026 = vmatprep.subr.bf16.mxu0 %v1025_v34  ;;  %v656_v34 = vld [vmem:[#allocation2 + $0x228] sm:$0xff] }
 0x11c   : > { %v1069_v39 = vpack.c.bf16 %v658_v35, %v656_v34 }
 0x11e   : > { %1052 = vmatpush1.bf16.msra.mxu1 %v1051_v25  ;;  %1028 = vmatpush1.bf16.msra.mxu0 %v1027_v43  ;;  %v662_v43 = vld [vmem:[#allocation2 + $0x258] sm:$0xff] }
 0x11f   : > { %1054 = vmatprep.subr.bf16.mxu1 %v1053_v28  ;;  %1030 = vmatprep.subr.bf16.mxu0 %v1029_v46  ;;  %v1073_v45 = vpack.c.bf16 %v662_v43, %v660_v42  ;;  %v659_v46 = vld [vmem:[#allocation2 + $0x240] sm:$0xff] }
 0x122   : > { %1056 = vmatpush1.bf16.msra.mxu1 %v1055_v37  ;;  %1032 = vmatpush1.bf16.msra.mxu0 %v1031_v51  ;;  %v1067_v37 = vpack.c.bf16 %v653_v32, %v651_v31 }
 0x123   : > { %1058 = vmatprep.subr.bf16.mxu1 %v1057_v40  ;;  %996 = vmatprep.subr.mxu0 %v1269_v0  ;;  %v655_v40 = vld [vmem:[#allocation2 + $0x220] sm:$0xff] }
 0x124   : > { %v1071_v44 = vpack.c.bf16 %v657_v41, %v655_v40 }
 0x126   : > { %1060 = vmatpush1.bf16.msra.mxu1 %v1059_v49  ;;  %v666_v49 = vld [vmem:[#allocation2 + $0x278] sm:$0xff] }
 0x127   : > { %1062 = vmatprep.subr.bf16.mxu1 %v1061_v50  ;;  %v1075_v50 = vpack.c.bf16 %v661_v47, %v659_v46  ;;  %v1077_v51 = vpack.c.bf16 %v666_v49, %v664_v48 }
 0x12a   : > { %1064 = vmatpush1.bf16.msra.mxu1 %v1063_v54  ;;  %v668_v54 = vld [vmem:[#allocation2 + $0x288] sm:$0xff] }
 0x12b   : > { %1066 = vmatprep.subr.bf16.mxu1 %v1065_v57  ;;  %v1081_v57 = vpack.c.bf16 %v670_v55, %v668_v54 }
 0x1a1   : > { %v409_v58 = vpop.xlane.xlu0 %408 }
 0x1a2   : > { %v411_v59 = vmax.f32 %v409_v58, 1e-16  ;;  %v402_v2 = vpop.xlane.xlu1 %401  ;;  %v667_v58 = vld [vmem:[#allocation2 + $0x280] sm:$0xff] }
 0x1a4   : > { %v415_v61 = vrot.slane %v411_v59, %v1419_v9  ;;  %v669_v59 = vld [vmem:[#allocation2 + $0x290] sm:$0xff] }
 0x1a5   : > { %v405_v60 = vpop.xlane.xlu0 %404 }
 0x1a6   : > { %v410_v62 = vmax.f32 %v405_v60, 1e-16  ;;  %v672_v60 = vld [vmem:[#allocation2 + $0x2a8] sm:$0xff] }
 0x1a8   : > { %v416_v63 = vmul.f32 %v415_v61, %v410_v62  ;;  %v674_v61 = vld [vmem:[#allocation2 + $0x2b8] sm:$0xff]  ;;  %v1083_v62 = vpack.c.bf16 %v669_v59, %v667_v58 }
 0x1aa   : > { %1158 = vrsqrt.f32 %v416_v63  ;;  %v1085_v63 = vpack.c.bf16 %v674_v61, %v672_v60 }
 0x1b4   : > { %v1159_v1 = vpop.eup %1158 }
 0x1b5   : > { %v418_v3 = vmul.f32 %v1159_v1, %v402_v2  ;;  %v671_v1 = vld [vmem:[#allocation2 + $0x2a0] sm:$0xff]  ;;  %v673_v2 = vld [vmem:[#allocation2 + $0x2b0] sm:$0xff] }
 0x1b6   : > { %v1087_v10 = vpack.c.bf16 %v673_v2, %v671_v1  ;;  %v812_v2 = vld [vmem:[%s1517_s5] sm:$0xf] }
 0x1b7   : > { %v419_v4 = vmul.f32 1.442695, %v418_v3  ;;  %v676_v3 = vld [vmem:[#allocation2 + $0x2c8] sm:$0xff] }
 0x1b9   : > { %1160 = vpow2.f32 %v419_v4  ;;  %v678_v4 = vld [vmem:[#allocation2 + $0x2d8] sm:$0xff] }
 0x1c3   : > { %v1161_v13 = vpop.eup %1160 }
 0x1c4   : > { %v421_v14 = vmul.f32 %v1161_v13, %v394_v11  ;;  %v428_v15 = vrot.slane %v1161_v13, 4 }
 0x1c6   : > { %v422_v16 = vrot.slane %v421_v14, 4  ;;  %v429_v17 = vadd.f32 %v1161_v13, %v428_v15  ;;  %v675_v13 = vld [vmem:[#allocation2 + $0x2c0] sm:$0xff]  ;;  %v680_v15 = vld [vmem:[#allocation2 + $0x2e8] sm:$0xff] }
 0x1c8   : > { %v430_v18 = vrot.slane %v429_v17, 2  ;;  %v423_v19 = vadd.f32 %v422_v16, %v421_v14  ;;  %v677_v14 = vld [vmem:[#allocation2 + $0x2d0] sm:$0xff]  ;;  %v682_v16 = vld [vmem:[#allocation2 + $0x2f8] sm:$0xff] }
 0x1ca   : > { %v431_v20 = vadd.f32 %v430_v18, %v429_v17  ;;  %v424_v22 = vrot.slane %v423_v19, 2  ;;  %v1091_v17 = vpack.c.bf16 %v677_v14, %v675_v13  ;;  %v1093_v18 = vpack.c.bf16 %v682_v16, %v680_v15 }
 0x1cc   : > { %v432_v21 = vrot.slane %v431_v20, 1  ;;  %v425_v24 = vadd.f32 %v424_v22, %v423_v19  ;;  %v679_v19 = vld [vmem:[#allocation2 + $0x2e0] sm:$0xff] }
 0x1ce   : > { %v433_v23 = vadd.f32 %v432_v21, %v431_v20  ;;  %v426_v25 = vrot.slane %v425_v24, 1  ;;  %v681_v20 = vld [vmem:[#allocation2 + $0x2f0] sm:$0xff] }
 0x1cf   : > { %v1095_v21 = vpack.c.bf16 %v681_v20, %v679_v19 }
 0x1d0   : > { %1162 = vrcp.f32 %v433_v23  ;;  %v427_v26 = vadd.f32 %v426_v25, %v425_v24  ;;  %v985_v23 = vsel %vm294_vm5, 1.0, %v1269_v0 }
 0x1da   : > { %v1163_v7 = vpop.eup %1162 }
 0x1db   : > { %v435_v27 = vmul.f32 %v1163_v7, %v427_v26  ;;  %v756_v7 = vld [vmem:[%s1516_s4] sm:$0x3] }
 0x1dd   : > { %v436_v28 = vmul.f32 %v1434_v12, %v435_v27  ;;  %v761_v27 = vrot.slane %v756_v7, %v306_v6  ;;  %v1271_v6 = vmov 0  }
 0x1de   : > { %1156 = vset.pattern.permute.xlu0 %v1271_v6 }
 0x1df   : > { %v437_v29 = vadd.f32 %v436_v28, %v394_v11  ;;  %v1089_v11 = vpack.c.bf16 %v678_v4, %v676_v3 }
 0x1e1   : > { %v1438_v30 = vmax.f32 %v437_v29, 0.0  ;;  %v765_v29 = vrot.slane %v756_v7, %v310_v8 }
 0x1e3   : > { %573 = vmatmul.mubr.f32.vlgmr.msra.gmra.mrb[2].mxu0 %v1438_v30  ;;  %v439_v36 = vrot.slane %v1438_v30, 7  ;;  %v441_v22 = vrot.slane %v1438_v30, 1 }
 0x1e4   : > { %998 = vmatprep.mubr.msk.f32.mxu0 %vm1270_vm6, %v1269_v0 }
 0x1e5   : > { %v440_v38 = vmul.f32 %v984_v33, %v439_v36  ;;  %v442_v24 = vmul.f32 %v985_v23, %v441_v22 }
 0x1e7   : > { %644 = vmatmul.mubr.f32.vlgmr.msra.gmra.mrb[0].mxu1 %v440_v38 }
 0x1e8   : > { %1068 = vmatpush1.bf16.msra.mxu1 %v1067_v37  ;;  %747 = vmatprep.mubr.f32.mxu1 %v1269_v0 }
 0x1e9   : > { %1070 = vmatprep.subr.bf16.mxu1 %v1069_v39 }
 0x1ec   : > { %1072 = vmatpush1.bf16.msra.mxu1 %v1071_v44 }
 0x1ed   : > { %1074 = vmatprep.subr.bf16.mxu1 %v1073_v45 }
 0x1f0   : > { %1076 = vmatpush1.bf16.msra.mxu1 %v1075_v50 }
 0x1f1   : > { %1078 = vmatprep.subr.bf16.mxu1 %v1077_v51 }
 0x1f4   : > { %1080 = vmatpush1.bf16.msra.mxu1 %v1079_v56 }
 0x1f5   : > { %1082 = vmatprep.subr.bf16.mxu1 %v1081_v57 }
 0x1f8   : > { %1084 = vmatpush1.bf16.msra.mxu1 %v1083_v62 }
 0x1f9   : > { %1086 = vmatprep.subr.bf16.mxu1 %v1085_v63 }
 0x1fc   : > { %1088 = vmatpush1.bf16.msra.mxu1 %v1087_v10 }
 0x1fd   : > { %1090 = vmatprep.subr.bf16.mxu1 %v1089_v11 }
 0x200   : > { %1092 = vmatpush1.bf16.msra.mxu1 %v1091_v17 }
 0x201   : > { %1094 = vmatprep.subr.bf16.mxu1 %v1093_v18 }
 0x204   : > { %1096 = vmatpush1.bf16.msra.mxu1 %v1095_v21 }
 0x207   : > { %748 = vmatmul.mubr.f32.vlgmr.msra.gmra.mrb[0].mxu1 %v442_v24 }
 0x2b6   : > { %v574_v25 = vpop.f32.mrb[2].mxu0 }
 0x2b7   : > { %v576_v26 = vpop.f32.mrb[3].mxu0 }
 0x2da   : > { %v749_v28 = vpop.f32.mrb[0].mxu1 }
 0x2db   : > { %v1097_v31 = vadd.f32 %v749_v28, %v574_v25  ;;  %v751_v30 = vpop.f32.mrb[1].mxu1 }
 0x2dc   : > { %v1098_v32 = vadd.f32 %v751_v30, %v576_v26 }
 0x2dd   : > { %v768_v33 = vadd.f32 %v1097_v31, %v761_v27 }
 0x2de   : > { %v769_v34 = vadd.f32 %v1098_v32, %v765_v29 }
 0x2df   : > { %v777_v35 = vmul.f32 %v768_v33, %v768_v33  ;;  %v773_v36 = vrot.slane %v768_v33, %v1419_v9 }
 0x2e1   : > { %778 = vadd.xlane.f32.xlu0 %v777_v35  ;;  %v780_v37 = vsel %vm406_vm2, %v777_v35, 0.0  ;;  %v774_v38 = vmul.f32 %v773_v36, %v768_v33 }
 0x2e2   : > { %781 = vadd.xlane.f32.xlu1 %v780_v37 }
 0x2e6   : > { %775 = vadd.xlane.f32.xlu1 %v774_v38 }
 0x2f7   : > { %816 = vperm.xlu0 %1156, %v813_v5  }
 0x36e   : > { %v779_v8 = vpop.xlane.xlu0 %778 }
 0x36f   : > { %v782_v39 = vpop.xlane.xlu1 %781  ;;  %v783_v41 = vmax.f32 %v779_v8, 1e-16 }
 0x370   : > { %v784_v40 = vmax.f32 %v782_v39, 1e-16 }
 0x372   : > { %v788_v42 = vrot.slane %v784_v40, %v1419_v9 }
 0x373   : > { %v776_v45 = vpop.xlane.xlu1 %775 }
 0x374   : > { %v789_v43 = vmul.f32 %v788_v42, %v783_v41 }
 0x376   : > { %1164 = vrsqrt.f32 %v789_v43  ;;  %v817_v3 = vpop.permute.xlu0 %816 }
 0x380   : > { %v1165_v44 = vpop.eup %1164 }
 0x381   : > { %v791_v46 = vmul.f32 %v1165_v44, %v776_v45 }
 0x383   : > { %v792_v47 = vmul.f32 1.442695, %v791_v46 }
 0x385   : > { %1166 = vpow2.f32 %v792_v47 }
 0x38f   : > { %v1167_v0 = vpop.eup %1166 }
 0x390   : > { %v801_v48 = vrot.slane %v1167_v0, 4  ;;  %v794_v49 = vmul.f32 %v1167_v0, %v769_v34 }
 0x392   : > { %v802_v50 = vadd.f32 %v1167_v0, %v801_v48  ;;  %v795_v51 = vrot.slane %v794_v49, 4 }
 0x394   : > { %v803_v52 = vrot.slane %v802_v50, 2  ;;  %v796_v53 = vadd.f32 %v795_v51, %v794_v49 }
 0x396   : > { %v804_v54 = vadd.f32 %v803_v52, %v802_v50  ;;  %v797_v56 = vrot.slane %v796_v53, 2 }
 0x398   : > { %v805_v55 = vrot.slane %v804_v54, 1  ;;  %v798_v9 = vadd.f32 %v797_v56, %v796_v53 }
 0x39a   : > { %v806_v57 = vadd.f32 %v805_v55, %v804_v54  ;;  %v799_v58 = vrot.slane %v798_v9, 1 }
 0x39c   : > { %1168 = vrcp.f32 %v806_v57  ;;  %v800_v59 = vadd.f32 %v799_v58, %v798_v9 }
 0x3a6   : > { %v1169_v60 = vpop.eup %1168 }
 0x3a7   : > { %v808_v61 = vmul.f32 %v1169_v60, %v800_v59 }
 0x3a9   : > { %v809_v62 = vmul.f32 %v1434_v12, %v808_v61 }
 0x3ab   : > { %v810_v63 = vadd.f32 %v809_v62, %v769_v34 }
 0x3ad   : > { %v811_v1 = vmax.f32 %v810_v63, 0.0 }
 0x3af   : > { %997 = vmatpush3.xpose.msra.mxu0 %v811_v1 }
 0x3b2   : > { %999 = vmatmul.mubr.f32.vlgmr.msra.gmra.mrb[4].mxu0 %v812_v2 }
 0x485   : > { %v885_v4 = vpop.f32.mrb[4].mxu0 }
 0x486   : > { %v886_v10 = vadd.f32 %v885_v4, %v817_v3  ;;  %v1000_v11 = vpop.f32.mrb[5].mxu0 }
 0x488   : > { %890 = vst.msk [vmem:[%s284_s13] sm:$0xf] %vm889_vm7, %v886_v10 }
 0x489   : > { %1211 = shalt.err (!%p1208_p7)
}
 0x48a   : > { %s1212_s17 = scalar_lea.hbm %s1470_s23, 64  ;;  %s1216_s15 = scalar_lea.hbm %s1519_s7, 128 }
 0x48b   : > { %p1213_p8 = scmp.ne.s32.totalorder %s1470_s23, %s1212_s17  ;;  %p1217_p1 = scmp.lt.u32.totalorder %s1470_s23, %s1519_s7 }
 0x48c   : > { %p1218_p0 = scmp.lt.u32.totalorder %s1216_s15, %s1212_s17  ;;  %p1220_p6 = scmp.lt.u32.totalorder %s1212_s17, %s1470_s23 }
 0x48d   : > { %p1214_p11 = pnand %p1213_p8, %p1530_p9 }
 0x48e   : > { %p1219_p5 = por %p1218_p0, %p1217_p1 }
 0x48f   : > { %p1215_p13 = pneg %p1214_p11 }
 0x490   : > { %p1221_p10 = por %p1220_p6, %p1219_p5 }
 0x492   : > { %p1222_p12 = pnand %p1221_p10, %p1215_p13 }
 0x494   : > { %1225 = shalt.err (!%p1222_p12)
}
 0x495   : > { %1105 = dma.vmem_to_hbm [thread:$0]  (%p1530_p9), %s1472_s20, 64, %s1470_s23, %s892_s29  }
 0x496 PF: > { %p1117_p2 = scmp.ge.s32.totalorder %s1264_s27, 2  ;;  %s917_s21 = sand.u32 1, %s1252_s24  }
 0x497   : > { %p1531_p3 = scmp.ne.s32.totalorder %s1524_s12, 0  ;;  %s918_s22 = scalar_lea.sflag [#allocation4], %s917_s21 }
 0x499   : > { %p1112_p4 = pnand %p1117_p2, %p1531_p3 }
 0x49b   : > { %1247 = dma.done.wait (!%p1112_p4), %s918_s22, 64  }
 0x49c   : > { %1249 = vsyncadd (!%p1112_p4), %s918_s22, 4294967232  ;;  %p18_p7 = scmp.ge.s32.totalorder %s1338_s30, 4   ;;  %s1532_s24 = smov %s1256_s25 }
 0x49d   : > { %s1533_s25 = smov %s1260_s26  ;;  %s1534_s26 = smov %s1349_s10 }
 0x49e   : > { %s1535_s27 = smov %s1338_s30  ;;  %20 = sbr.rel (!%p18_p7) target bundleno = 4 (0x4), region = 90 }
 0x4a5   :  { %923 = vsyncpa [#allocation3], 1 }
 0x4a6   :  { %925 = vsyncpa [#allocation3 + $0x1], 1 }
 0x4a7   :  { %926 = vsyncpa [#allocation4], 1 }
 0x4a8   :  { %928 = vsyncpa [#allocation4 + $0x1], 1 }

</bundles_post_ra>
